<compile_context>
chip_gen: v5e
topology: v5e:2x2
jax: 0.10.0
libtpu: 0.0.40
codegen_flags: <defaults>
</compile_context>

<pallas_src>
import jax
import jax.numpy as jnp
from jax.experimental import pallas as pl
from jax.experimental.pallas import tpu as pltpu


TOKEN_TILE = 256   # MXU M-dimension tile (multiple of 128; good on v5e/v6e/v7x)
LANE = 128         # lane width — pad V (MXU K) and D (output lanes) to this


def _round_up(x, m):
    return ((x + m - 1) // m) * m


def _embedding_kernel(idx_ref, table_ref, out_ref):
    # idx_ref:   (N_pad, 1)          int32  (VMEM, whole array resident)
    # table_ref: (V_pad, D_pad)      float  (VMEM, whole table resident)
    # out_ref:   (TOKEN_TILE, D_pad) float  (lane-dense store)
    i = pl.program_id(0)
    start = pl.multiple_of(i * TOKEN_TILE, TOKEN_TILE)
    idx = idx_ref[pl.ds(start, TOKEN_TILE), :]                       # (T, 1)

    v_pad = table_ref.shape[0]
    vocab_iota = jax.lax.broadcasted_iota(jnp.int32, (TOKEN_TILE, v_pad), 1)
    onehot = (vocab_iota == idx).astype(table_ref.dtype)             # (T, V_pad)

    # Exact row-select via MXU; accumulate in f32, cast to the output dtype
    # (a no-op for f32 tables).
    out_ref[...] = jnp.dot(
        onehot, table_ref[...], preferred_element_type=jnp.float32
    ).astype(out_ref.dtype)


def character_embedding(x, table):
    """Pallas equivalent of CharacterEmbedding.forward.

    x:     integer indices of shape (B, L)
    table: embedding table of shape (V, D)
    returns array of shape (B, L, D) with dtype of `table`
    """
    B, L = x.shape
    V, D = table.shape
    N = B * L

    # Pad token count so the big MXU-friendly tile is used unconditionally.
    N_pad = _round_up(max(N, TOKEN_TILE), TOKEN_TILE)
    # Pad vocab (MXU K) and embedding dim (output lanes) to lane width.
    V_pad = _round_up(V, LANE)
    D_pad = _round_up(D, LANE)

    idx_flat = x.reshape(N).astype(jnp.int32)
    if N_pad != N:
        # Padded tokens point at row 0 (the zeroed padding_idx row); their
        # output rows are sliced off below, so this is harmless.
        idx_flat = jnp.concatenate(
            [idx_flat, jnp.zeros((N_pad - N,), jnp.int32)]
        )
    idx_flat = idx_flat.reshape(N_pad, 1)

    if V_pad != V or D_pad != D:
        table_p = jnp.zeros((V_pad, D_pad), table.dtype).at[:V, :D].set(table)
    else:
        table_p = table

    grid = (N_pad // TOKEN_TILE,)

    out_flat = pl.pallas_call(
        _embedding_kernel,
        out_shape=jax.ShapeDtypeStruct((N_pad, D_pad), table.dtype),
        grid_spec=pltpu.PrefetchScalarGridSpec(
            num_scalar_prefetch=0,
            grid=grid,
            in_specs=[
                # Whole (padded) index array as one resident block: no tiny
                # per-step index DMAs; sliced in-kernel with pl.ds.
                pl.BlockSpec((N_pad, 1), lambda i: (0, 0)),
                # Whole (padded) table resident across the grid.
                pl.BlockSpec((V_pad, D_pad), lambda i: (0, 0)),
            ],
            out_specs=pl.BlockSpec((TOKEN_TILE, D_pad), lambda i: (i, 0)),
        ),
        compiler_params=pltpu.CompilerParams(
            # Token-tile axis is independent → shard across TensorCores
            # (the only way to use the 2nd TC on v7x).
            dimension_semantics=("parallel",),
        ),
    )(idx_flat, table_p)

    return out_flat[:N, :D].reshape(B, L, D)


if __name__ == "__main__":
    # Module hyper-parameters (synthetic, deterministic init).
    vocab_size = 48
    embedding_dim = 32
    padding_idx = 0

    key = jax.random.PRNGKey(0)
    k_table, k_idx = jax.random.split(key)

    # nn.Embedding default init: N(0, 1), with padding_idx row zeroed.
    table = jax.random.normal(k_table, (vocab_size, embedding_dim), jnp.float32)
    table = table.at[padding_idx].set(0.0)

    # Example input: batch=2, seq_len=8 of character indices.
    B, L = 2, 8
    x = jax.random.randint(k_idx, (B, L), 0, vocab_size, dtype=jnp.int32)

    out = character_embedding(x, table)
    out = jax.block_until_ready(out)

    # Reference check (plain JAX gather).
    ref = table[x]
    assert out.shape == (B, L, embedding_dim)
    assert jnp.allclose(out, ref, atol=1e-6), "mismatch vs reference gather"

    print("KERNEL_OK")
</pallas_src>

<mosaic_0001>
module attributes {stable_mosaic.version = 11 : i64} {
  func.func @_embedding_kernel(%arg0: i32, %arg1: memref<256x1xi32, #tpu.memory_space<vmem>>, %arg2: memref<128x128xf32, #tpu.memory_space<vmem>>, %arg3: memref<256x128xf32, #tpu.memory_space<vmem>>) attributes {dimension_semantics = [#tpu.dimension_semantics<parallel>], iteration_bounds = array<i64: 1>, scalar_prefetch = 0 : i64, scratch_operands = 0 : i64, tpu.core_type = #tpu.core_type<tc>, window_params = [{pipeline_mode = #tpu.pipeline_mode<synchronous>, transform_indices = @transform_0, window_bounds = array<i64: 256, 1>}, {pipeline_mode = #tpu.pipeline_mode<synchronous>, transform_indices = @transform_1, window_bounds = array<i64: 128, 128>}, {transform_indices = @transform_2, window_bounds = array<i64: 256, 128>}]} {
    %c256_i32 = arith.constant 256 : i32
    %0 = arith.muli %arg0, %c256_i32 : i32
    %1 = tpu.assume_multiple %0, 256 : i32
    %2 = arith.index_cast %1 : i32 to index
    %c0 = arith.constant 0 : index
    %3 = vector.load %arg1[%2, %c0] : memref<256x1xi32, #tpu.memory_space<vmem>>, vector<256x1xi32>
    %4 = tpu.iota {dimensions = array<i32: 1>} : vector<256x128xi32>
    %5 = vector.broadcast %3 : vector<256x1xi32> to vector<256x128xi32>
    %6 = arith.cmpi eq, %4, %5 : vector<256x128xi32>
    %7 = arith.extui %6 : vector<256x128xi1> to vector<256x128xi32>
    %8 = arith.sitofp %7 : vector<256x128xi32> to vector<256x128xf32>
    %c0_0 = arith.constant 0 : index
    %c0_1 = arith.constant 0 : index
    %9 = vector.load %arg2[%c0_0, %c0_1] : memref<128x128xf32, #tpu.memory_space<vmem>>, vector<128x128xf32>
    %cst = arith.constant dense<0.000000e+00> : vector<256x128xf32>
    %10 = tpu.matmul %8, %9, %cst {dimension_numbers = #tpu.dot_dimension_numbers<[1], [0], [0], [1], [0, 0, 1, 1], [], []>} : vector<256x128xf32>, vector<128x128xf32>, vector<256x128xf32> -> vector<256x128xf32>
    %c0_2 = arith.constant 0 : index
    %c0_3 = arith.constant 0 : index
    %11 = vector.load %arg3[%c0_2, %c0_3] : memref<256x128xf32, #tpu.memory_space<vmem>>, vector<256x128xf32>
    tpu.vector_store %arg3[%c0_2, %c0_3], %10 {strides = array<i32>} : memref<256x128xf32, #tpu.memory_space<vmem>>, vector<256x128xf32>,
    return
  }
  func.func @transform_0(%arg0: i32) -> (i32, i32) {
    %c0_i32 = arith.constant 0 : i32
    %c0_i32_0 = arith.constant 0 : i32
    %c0_i32_1 = arith.constant 0 : i32
    return %c0_i32, %c0_i32_0 : i32, i32
  }
  func.func @transform_1(%arg0: i32) -> (i32, i32) {
    %c0_i32 = arith.constant 0 : i32
    %c0_i32_0 = arith.constant 0 : i32
    %c0_i32_1 = arith.constant 0 : i32
    return %c0_i32, %c0_i32_0 : i32, i32
  }
  func.func @transform_2(%arg0: i32) -> (i32, i32) {
    %c0_i32 = arith.constant 0 : i32
    %c0_i32_0 = arith.constant 0 : i32
    return %arg0, %c0_i32 : i32, i32
  }
}

</mosaic_0001>

<bundles_post_ra>
// kernel: tpu_custom_call.1
= control target key start
LH: loop header
LB: loop body
LE: loop exit
PB: predicated region body
PF: predicated region fallthrough
CT: control target
= control target key end

     0   :  { %v565_v3 = vmov 0   ;;  %s798_s0 = inlined_call_operand.vmem [shape: s32[256,1], index: 0, kind: input, shape index: {}]   ;;  %s799_s1 = inlined_call_operand.vmem [shape: f32[128,128], index: 1, kind: input, shape index: {}]   ;;  %s800_s2 = inlined_call_operand.hbm [shape: f32[256,128], index: 2, kind: output, shape index: {}]  }
   0x1   :  { %v31_v0 = vld [vmem:[%s798_s0 + $0x88] sm:$0xff]  ;;  %v30_v1 = vld [vmem:[%s798_s0 + $0x80] sm:$0xff]  ;;  %538 = vset.pattern.permute.xlu2 %v565_v3  ;;  %537 = vset.pattern.permute.xlu1 %v565_v3 }
   0x2   :  { %v14_v2 = vld [vmem:[%s798_s0] sm:$0xff]  ;;  %536 = vset.pattern.permute.xlu0 %v565_v3  ;;  %100 = vperm.xlu2 %538, %v31_v0  }
   0x3   :  { %97 = vperm.xlu0 %536, %v30_v1   ;;  %49 = vperm.xlu1 %537, %v14_v2  }
   0x4   :  { %7 = vsyncpa [#allocation3], 0  ;;  %v39_v4 = vld [vmem:[%s798_s0 + $0xc8] sm:$0xff]  ;;  %v38_v5 = vld [vmem:[%s798_s0 + $0xc0] sm:$0xff]  ;;  %v46_v51 = vlaneseq  ;;  %v566_v56 = vmov 1.0   ;;  %s407_s23 = sshll.u32 %s800_s2, 4  ;;  %s408_s23 = int_to_ptr.hbm [resolvable:$true] %s407_s23 }
   0x5   :  { %v22_v6 = vld [vmem:[%s798_s0 + $0x40] sm:$0xff]  ;;  %v32_v7 = vld [vmem:[%s798_s0 + $0x90] sm:$0xff]  ;;  %v15_v8 = vld [vmem:[%s798_s0 + $0x8] sm:$0xff]  ;;  %s568_s24 = smov 128   ;;  %s569_s25 = smov 8  }
   0x6   :  { %v23_v9 = vld [vmem:[%s798_s0 + $0x48] sm:$0xff]  ;;  %v24_v10 = vld [vmem:[%s798_s0 + $0x50] sm:$0xff]  ;;  %v17_v13 = vld [vmem:[%s798_s0 + $0x18] sm:$0xff]  ;;  %v729_v52 = vand.u32 127, %v46_v51 }
   0x7   :  { %v40_v11 = vld [vmem:[%s798_s0 + $0xd0] sm:$0xff]  ;;  %v33_v14 = vld [vmem:[%s798_s0 + $0x98] sm:$0xff]  ;;  %v42_v16 = vld [vmem:[%s798_s0 + $0xe0] sm:$0xff] }
   0x8   :  { %v16_v12 = vld [vmem:[%s798_s0 + $0x10] sm:$0xff]  ;;  %v41_v15 = vld [vmem:[%s798_s0 + $0xd8] sm:$0xff]  ;;  %v34_v18 = vld [vmem:[%s798_s0 + $0xa0] sm:$0xff] }
   0x9   :  { %v25_v17 = vld [vmem:[%s798_s0 + $0x58] sm:$0xff]  ;;  %v35_v19 = vld [vmem:[%s798_s0 + $0xa8] sm:$0xff]  ;;  %v18_v20 = vld [vmem:[%s798_s0 + $0x20] sm:$0xff] }
   0xa   :  { %124 = vperm.xlu2 %538, %v39_v4   ;;  %v26_v21 = vld [vmem:[%s798_s0 + $0x60] sm:$0xff]  ;;  %v255_v22 = vld [vmem:[%s799_s1 + $0x78] sm:$0xff]  ;;  %v254_v23 = vld [vmem:[%s799_s1 + $0x70] sm:$0xff] }
   0xb   :  { %121 = vperm.xlu0 %536, %v38_v5   ;;  %73 = vperm.xlu1 %537, %v22_v6   ;;  %v253_v24 = vld [vmem:[%s799_s1 + $0x68] sm:$0xff]  ;;  %v252_v28 = vld [vmem:[%s799_s1 + $0x60] sm:$0xff]  ;;  %v251_v29 = vld [vmem:[%s799_s1 + $0x58] sm:$0xff] }
   0xc   :  { %256 = vmatpush.msra.mxu0 %v255_v22  ;;  %484 = vmatpush.msra.mxu2 %v255_v22  ;;  %v27_v25 = vld [vmem:[%s798_s0 + $0x68] sm:$0xff]  ;;  %v20_v30 = vld [vmem:[%s798_s0 + $0x30] sm:$0xff]  ;;  %v248_v35 = vld [vmem:[%s799_s1 + $0x40] sm:$0xff] }
   0xd   :  { %483 = vmatpush.msra.mxu1 %v255_v22  ;;  %485 = vmatpush.msra.mxu3 %v255_v22  ;;  %v43_v26 = vld [vmem:[%s798_s0 + $0xe8] sm:$0xff]  ;;  %v250_v31 = vld [vmem:[%s799_s1 + $0x50] sm:$0xff]  ;;  %v247_v36 = vld [vmem:[%s799_s1 + $0x38] sm:$0xff] }
   0xe   :  { %257 = vmatpush.msra.mxu0 %v254_v23  ;;  %487 = vmatpush.msra.mxu2 %v254_v23  ;;  %v19_v27 = vld [vmem:[%s798_s0 + $0x28] sm:$0xff]  ;;  %v36_v32 = vld [vmem:[%s798_s0 + $0xb0] sm:$0xff]  ;;  %v45_v37 = vld [vmem:[%s798_s0 + $0xf8] sm:$0xff] }
   0xf   :  { %486 = vmatpush.msra.mxu1 %v254_v23  ;;  %488 = vmatpush.msra.mxu3 %v254_v23  ;;  %v44_v33 = vld [vmem:[%s798_s0 + $0xf0] sm:$0xff]  ;;  %v249_v34 = vld [vmem:[%s799_s1 + $0x48] sm:$0xff]  ;;  %v37_v39 = vld [vmem:[%s798_s0 + $0xb8] sm:$0xff] }
  0x10   :  { %258 = vmatpush.msra.mxu0 %v253_v24  ;;  %490 = vmatpush.msra.mxu2 %v253_v24  ;;  %v28_v38 = vld [vmem:[%s798_s0 + $0x70] sm:$0xff]  ;;  %v245_v41 = vld [vmem:[%s799_s1 + $0x28] sm:$0xff]  ;;  %v244_v42 = vld [vmem:[%s799_s1 + $0x20] sm:$0xff] }
  0x11   :  { %489 = vmatpush.msra.mxu1 %v253_v24  ;;  %491 = vmatpush.msra.mxu3 %v253_v24  ;;  %v246_v40 = vld [vmem:[%s799_s1 + $0x30] sm:$0xff]  ;;  %v243_v43 = vld [vmem:[%s799_s1 + $0x18] sm:$0xff]  ;;  %v241_v47 = vld [vmem:[%s799_s1 + $0x8] sm:$0xff] }
  0x12   :  { %103 = vperm.xlu2 %538, %v32_v7   ;;  %259 = vmatpush.msra.mxu0 %v252_v28  ;;  %v21_v44 = vld [vmem:[%s798_s0 + $0x38] sm:$0xff]  ;;  %v242_v46 = vld [vmem:[%s799_s1 + $0x10] sm:$0xff]  ;;  %v240_v48 = vld [vmem:[%s799_s1] sm:$0xff]  ;;  %s567_s1 = smov [#allocation2]  }
  0x13   :  { %52 = vperm.xlu0 %536, %v15_v8   ;;  %76 = vperm.xlu1 %537, %v23_v9   ;;  %v29_v45 = vld [vmem:[%s798_s0 + $0x78] sm:$0xff]  ;;  %s405_s20 = sshll.u32 %s567_s1, 4  ;;  %s406_s20 = int_to_ptr.vmem [resolvable:$true] %s405_s20 }
  0x14   :  { %493 = vmatpush.msra.mxu2 %v252_v28  ;;  %492 = vmatpush.msra.mxu1 %v252_v28 }
  0x15   :  { %494 = vmatpush.msra.mxu3 %v252_v28  ;;  %260 = vmatpush.msra.mxu0 %v251_v29 }
  0x16   :  { %496 = vmatpush.msra.mxu2 %v251_v29  ;;  %495 = vmatpush.msra.mxu1 %v251_v29 }
  0x17   :  { %497 = vmatpush.msra.mxu3 %v251_v29  ;;  %261 = vmatpush.msra.mxu0 %v250_v31 }
  0x18   :  { %499 = vmatpush.msra.mxu2 %v250_v31  ;;  %498 = vmatpush.msra.mxu1 %v250_v31 }
  0x19   :  { %262 = vmatpush.msra.mxu0 %v249_v34  ;;  %500 = vmatpush.msra.mxu3 %v250_v31 }
  0x1a   :  { %79 = vperm.xlu2 %538, %v24_v10   ;;  %502 = vmatpush.msra.mxu2 %v249_v34 }
  0x1b   :  { %127 = vperm.xlu0 %536, %v40_v11   ;;  %55 = vperm.xlu1 %537, %v16_v12  }
  0x1c   :  { %263 = vmatpush.msra.mxu0 %v248_v35  ;;  %501 = vmatpush.msra.mxu1 %v249_v34 }
  0x1d   :  { %503 = vmatpush.msra.mxu3 %v249_v34  ;;  %505 = vmatpush.msra.mxu2 %v248_v35 }
  0x1e   :  { %264 = vmatpush.msra.mxu0 %v247_v36  ;;  %504 = vmatpush.msra.mxu1 %v248_v35 }
  0x1f   :  { %506 = vmatpush.msra.mxu3 %v248_v35  ;;  %508 = vmatpush.msra.mxu2 %v247_v36 }
  0x20   :  { %265 = vmatpush.msra.mxu0 %v246_v40  ;;  %507 = vmatpush.msra.mxu1 %v247_v36 }
  0x21   :  { %511 = vmatpush.msra.mxu2 %v246_v40  ;;  %509 = vmatpush.msra.mxu3 %v247_v36 }
  0x22   :  { %58 = vperm.xlu2 %538, %v17_v13   ;;  %266 = vmatpush.msra.mxu0 %v245_v41 }
  0x23   :  { %106 = vperm.xlu0 %536, %v33_v14   ;;  %130 = vperm.xlu1 %537, %v41_v15  }
  0x24   :  { %514 = vmatpush.msra.mxu2 %v245_v41  ;;  %510 = vmatpush.msra.mxu1 %v246_v40 }
  0x25   :  { %512 = vmatpush.msra.mxu3 %v246_v40  ;;  %267 = vmatpush.msra.mxu0 %v244_v42 }
  0x26   :  { %517 = vmatpush.msra.mxu2 %v244_v42  ;;  %513 = vmatpush.msra.mxu1 %v245_v41 }
  0x27   :  { %515 = vmatpush.msra.mxu3 %v245_v41  ;;  %268 = vmatpush.msra.mxu0 %v243_v43 }
  0x28   :  { %520 = vmatpush.msra.mxu2 %v243_v43  ;;  %516 = vmatpush.msra.mxu1 %v244_v42 }
  0x29   :  { %269 = vmatpush.msra.mxu0 %v242_v46  ;;  %518 = vmatpush.msra.mxu3 %v244_v42 }
  0x2a   :  { %133 = vperm.xlu2 %538, %v42_v16   ;;  %523 = vmatpush.msra.mxu2 %v242_v46 }
  0x2b   :  { %82 = vperm.xlu0 %536, %v25_v17   ;;  %109 = vperm.xlu1 %537, %v34_v18  }
  0x2c   :  { %270 = vmatpush.msra.mxu0 %v241_v47  ;;  %526 = vmatpush.msra.mxu2 %v241_v47 }
  0x2d   :  { %519 = vmatpush.msra.mxu1 %v243_v43  ;;  %521 = vmatpush.msra.mxu3 %v243_v43 }
  0x2e   :  { %271 = vmatpush.msra.mxu0 %v240_v48  ;;  %529 = vmatpush.msra.mxu2 %v240_v48 }
  0x2f   :  { %522 = vmatpush.msra.mxu1 %v242_v46  ;;  %524 = vmatpush.msra.mxu3 %v242_v46 }
  0x31   :  { %525 = vmatpush.msra.mxu1 %v241_v47  ;;  %527 = vmatpush.msra.mxu3 %v241_v47 }
  0x32   :  { %112 = vperm.xlu2 %538, %v35_v19  }
  0x33   :  { %61 = vperm.xlu0 %536, %v18_v20   ;;  %85 = vperm.xlu1 %537, %v26_v21  }
  0x34   :  { %528 = vmatpush.msra.mxu1 %v240_v48  ;;  %530 = vmatpush.msra.mxu3 %v240_v48 }
  0x3a   :  { %88 = vperm.xlu2 %538, %v27_v25  }
  0x3b   :  { %136 = vperm.xlu0 %536, %v43_v26   ;;  %64 = vperm.xlu1 %537, %v19_v27  }
  0x42   :  { %67 = vperm.xlu2 %538, %v20_v30  }
  0x43   :  { %115 = vperm.xlu0 %536, %v36_v32   ;;  %139 = vperm.xlu1 %537, %v44_v33  }
  0x4a   :  { %142 = vperm.xlu2 %538, %v45_v37  }
  0x4b   :  { %91 = vperm.xlu0 %536, %v28_v38   ;;  %118 = vperm.xlu1 %537, %v37_v39  }
  0x53   :  { %70 = vperm.xlu0 %536, %v21_v44   ;;  %94 = vperm.xlu1 %537, %v29_v45  }
  0x5c   :  { %v101_v49 = vpop.permute.xlu2 %100 }
  0x5d   :  { %vm161_vm2 = vcmp.eq.s32.totalorder %v729_v52, %v101_v49 }
  0x64   :  { %v125_v50 = vpop.permute.xlu2 %124 }
  0x65   :  { %vm169_vm7 = vcmp.eq.s32.totalorder %v729_v52, %v125_v50 }
  0x6c   :  { %v104_v55 = vpop.permute.xlu2 %103 }
  0x6d   :  { %vm162_vm8 = vcmp.eq.s32.totalorder %v729_v52, %v104_v55 }
  0x74   :  { %v80_v59 = vpop.permute.xlu2 %79 }
  0x75   :  { %v98_v53 = vpop.permute.xlu0 %97  ;;  %v50_v54 = vpop.permute.xlu1 %49  ;;  %vm154_vm9 = vcmp.eq.s32.totalorder %v729_v52, %v80_v59 }
  0x76   :  { %vm160_vm0 = vcmp.eq.s32.totalorder %v729_v52, %v98_v53  ;;  %vm144_vm1 = vcmp.eq.s32.totalorder %v729_v52, %v50_v54 }
  0x77   :  { %451 = vmatmul.msk.f32.vlgmr.msra.gmra.mxu0 %vm144_vm1, %v566_v56  ;;  %467 = vmatmul.msk.f32.vlgmr.msra.gmra.mxu2 %vm160_vm0, %v566_v56 }
  0x7c   :  { %v59_v62 = vpop.permute.xlu2 %58 }
  0x7d   :  { %v122_v57 = vpop.permute.xlu0 %121  ;;  %v74_v58 = vpop.permute.xlu1 %73  ;;  %vm147_vm12 = vcmp.eq.s32.totalorder %v729_v52, %v59_v62 }
  0x7e   :  { %vm168_vm3 = vcmp.eq.s32.totalorder %v729_v52, %v122_v57  ;;  %vm152_vm4 = vcmp.eq.s32.totalorder %v729_v52, %v74_v58 }
  0x7f   :  { %459 = vmatmul.msk.f32.vlgmr.msra.gmra.mxu1 %vm152_vm4, %v566_v56  ;;  %468 = vmatmul.msk.f32.gmra.mxu2 %vm161_vm2, %v566_v56 }
  0x80   :  { %475 = vmatmul.msk.f32.vlgmr.msra.gmra.mxu3 %vm168_vm3, %v566_v56 }
  0x84   :  { %v134_v1 = vpop.permute.xlu2 %133 }
  0x85   :  { %v53_v60 = vpop.permute.xlu0 %52  ;;  %v77_v61 = vpop.permute.xlu1 %76  ;;  %vm172_vm1 = vcmp.eq.s32.totalorder %v729_v52, %v134_v1 }
  0x86   :  { %vm145_vm5 = vcmp.eq.s32.totalorder %v729_v52, %v53_v60  ;;  %vm153_vm6 = vcmp.eq.s32.totalorder %v729_v52, %v77_v61 }
  0x87   :  { %452 = vmatmul.msk.f32.gmra.mxu0 %vm145_vm5, %v566_v56  ;;  %460 = vmatmul.msk.f32.gmra.mxu1 %vm153_vm6, %v566_v56 }
  0x88   :  { %469 = vmatmul.msk.f32.gmra.mxu2 %vm162_vm8, %v566_v56  ;;  %476 = vmatmul.msk.f32.gmra.mxu3 %vm169_vm7, %v566_v56 }
  0x8c   :  { %v113_v6 = vpop.permute.xlu2 %112 }
  0x8d   :  { %v128_v63 = vpop.permute.xlu0 %127  ;;  %v56_v0 = vpop.permute.xlu1 %55  ;;  %vm165_vm4 = vcmp.eq.s32.totalorder %v729_v52, %v113_v6 }
  0x8e   :  { %vm170_vm10 = vcmp.eq.s32.totalorder %v729_v52, %v128_v63  ;;  %vm146_vm11 = vcmp.eq.s32.totalorder %v729_v52, %v56_v0 }
  0x8f   :  { %453 = vmatmul.msk.f32.gmra.mxu0 %vm146_vm11, %v566_v56  ;;  %461 = vmatmul.msk.f32.gmra.mxu1 %vm154_vm9, %v566_v56 }
  0x90   :  { %477 = vmatmul.msk.f32.gmra.mxu3 %vm170_vm10, %v566_v56 }
  0x94   :  { %v89_v9 = vpop.permute.xlu2 %88 }
  0x95   :  { %v107_v2 = vpop.permute.xlu0 %106  ;;  %v131_v3 = vpop.permute.xlu1 %130  ;;  %vm157_vm5 = vcmp.eq.s32.totalorder %v729_v52, %v89_v9 }
  0x96   :  { %vm163_vm13 = vcmp.eq.s32.totalorder %v729_v52, %v107_v2  ;;  %vm171_vm14 = vcmp.eq.s32.totalorder %v729_v52, %v131_v3 }
  0x97   :  { %454 = vmatmul.msk.f32.gmra.mxu0 %vm147_vm12, %v566_v56  ;;  %470 = vmatmul.msk.f32.gmra.mxu2 %vm163_vm13, %v566_v56 }
  0x98   :  { %478 = vmatmul.msk.f32.gmra.mxu3 %vm171_vm14, %v566_v56 }
  0x9c   :  { %v68_v12 = vpop.permute.xlu2 %67 }
  0x9d   :  { %v83_v4 = vpop.permute.xlu0 %82  ;;  %v110_v5 = vpop.permute.xlu1 %109  ;;  %vm150_vm8 = vcmp.eq.s32.totalorder %v729_v52, %v68_v12 }
  0x9e   :  { %vm155_vm15 = vcmp.eq.s32.totalorder %v729_v52, %v83_v4  ;;  %vm164_vm0 = vcmp.eq.s32.totalorder %v729_v52, %v110_v5 }
  0x9f   :  { %462 = vmatmul.msk.f32.gmra.mxu1 %vm155_vm15, %v566_v56  ;;  %471 = vmatmul.msk.f32.gmra.mxu2 %vm164_vm0, %v566_v56 }
  0xa0   :  { %479 = vmatmul.msk.f32.gmra.mxu3 %vm172_vm1, %v566_v56 }
  0xa4   :  { %v143_v15 = vpop.permute.xlu2 %142 }
  0xa5   :  { %v62_v7 = vpop.permute.xlu0 %61  ;;  %v86_v8 = vpop.permute.xlu1 %85  ;;  %vm175_vm13 = vcmp.eq.s32.totalorder %v729_v52, %v143_v15 }
  0xa6   :  { %vm148_vm2 = vcmp.eq.s32.totalorder %v729_v52, %v62_v7  ;;  %vm156_vm3 = vcmp.eq.s32.totalorder %v729_v52, %v86_v8 }
  0xa7   :  { %455 = vmatmul.msk.f32.gmra.mxu0 %vm148_vm2, %v566_v56  ;;  %463 = vmatmul.msk.f32.gmra.mxu1 %vm156_vm3, %v566_v56 }
  0xa8   :  { %472 = vmatmul.msk.f32.gmra.mxu2 %vm165_vm4, %v566_v56 }
  0xad   :  { %v137_v10 = vpop.permute.xlu0 %136  ;;  %v65_v11 = vpop.permute.xlu1 %64 }
  0xae   :  { %vm173_vm6 = vcmp.eq.s32.totalorder %v729_v52, %v137_v10  ;;  %vm149_vm7 = vcmp.eq.s32.totalorder %v729_v52, %v65_v11 }
  0xaf   :  { %456 = vmatmul.msk.f32.gmra.mxu0 %vm149_vm7, %v566_v56  ;;  %464 = vmatmul.msk.f32.gmra.mxu1 %vm157_vm5, %v566_v56 }
  0xb0   :  { %480 = vmatmul.msk.f32.gmra.mxu3 %vm173_vm6, %v566_v56 }
  0xb5   :  { %v116_v13 = vpop.permute.xlu0 %115  ;;  %v140_v14 = vpop.permute.xlu1 %139 }
  0xb6   :  { %vm166_vm9 = vcmp.eq.s32.totalorder %v729_v52, %v116_v13  ;;  %vm174_vm10 = vcmp.eq.s32.totalorder %v729_v52, %v140_v14 }
  0xb7   :  { %457 = vmatmul.msk.f32.gmra.mxu0 %vm150_vm8, %v566_v56  ;;  %473 = vmatmul.msk.f32.gmra.mxu2 %vm166_vm9, %v566_v56 }
  0xb8   :  { %481 = vmatmul.msk.f32.gmra.mxu3 %vm174_vm10, %v566_v56 }
  0xbd   :  { %v92_v16 = vpop.permute.xlu0 %91  ;;  %v119_v17 = vpop.permute.xlu1 %118 }
  0xbe   :  { %vm158_vm11 = vcmp.eq.s32.totalorder %v729_v52, %v92_v16  ;;  %vm167_vm12 = vcmp.eq.s32.totalorder %v729_v52, %v119_v17 }
  0xbf   :  { %465 = vmatmul.msk.f32.gmra.mxu1 %vm158_vm11, %v566_v56  ;;  %474 = vmatmul.msk.f32.gmra.mxu2 %vm167_vm12, %v566_v56 }
  0xc0   :  { %482 = vmatmul.msk.f32.gmra.mxu3 %vm175_vm13, %v566_v56 }
  0xc5   :  { %v71_v18 = vpop.permute.xlu0 %70  ;;  %v95_v19 = vpop.permute.xlu1 %94 }
  0xc6   :  { %vm151_vm14 = vcmp.eq.s32.totalorder %v729_v52, %v71_v18  ;;  %vm159_vm15 = vcmp.eq.s32.totalorder %v729_v52, %v95_v19 }
  0xc7   :  { %458 = vmatmul.msk.f32.gmra.mxu0 %vm151_vm14, %v566_v56  ;;  %466 = vmatmul.msk.f32.gmra.mxu1 %vm159_vm15, %v566_v56 }
  0xf4   :  { %v273_v20 = vpop.f32.mrf.mxu0 }
  0xf5   :  { %369 = vst [vmem:[#allocation2] sm:$0xff] %v273_v20 }
  0xfa   :  { %v321_v21 = vpop.f32.mrf.mxu2 }
  0xfb   :  { %385 = vst [vmem:[#allocation2 + $0x80] sm:$0xff] %v321_v21 }
  0xfc   :  { %v297_v22 = vpop.f32.mrf.mxu1 }
  0xfd   :  { %377 = vst [vmem:[#allocation2 + $0x40] sm:$0xff] %v297_v22 }
 0x102   :  { %v324_v23 = vpop.f32.mrf.mxu2 }
 0x103   :  { %386 = vst [vmem:[#allocation2 + $0x88] sm:$0xff] %v324_v23  ;;  %v345_v24 = vpop.f32.mrf.mxu3 }
 0x104   :  { %393 = vst [vmem:[#allocation2 + $0xc0] sm:$0xff] %v345_v24  ;;  %v276_v25 = vpop.f32.mrf.mxu0  ;;  %v300_v26 = vpop.f32.mrf.mxu1 }
 0x105   :  { %370 = vst [vmem:[#allocation2 + $0x8] sm:$0xff] %v276_v25 }
 0x106   :  { %378 = vst [vmem:[#allocation2 + $0x48] sm:$0xff] %v300_v26 }
 0x10b   :  { %v327_v27 = vpop.f32.mrf.mxu2  ;;  %v348_v28 = vpop.f32.mrf.mxu3 }
 0x10c   :  { %387 = vst [vmem:[#allocation2 + $0x90] sm:$0xff] %v327_v27  ;;  %v279_v29 = vpop.f32.mrf.mxu0  ;;  %v303_v30 = vpop.f32.mrf.mxu1 }
 0x10d   :  { %394 = vst [vmem:[#allocation2 + $0xc8] sm:$0xff] %v348_v28 }
 0x10e   :  { %371 = vst [vmem:[#allocation2 + $0x10] sm:$0xff] %v279_v29 }
 0x10f   :  { %379 = vst [vmem:[#allocation2 + $0x50] sm:$0xff] %v303_v30 }
 0x113   :  { %v351_v31 = vpop.f32.mrf.mxu3 }
 0x114   :  { %395 = vst [vmem:[#allocation2 + $0xd0] sm:$0xff] %v351_v31  ;;  %v282_v32 = vpop.f32.mrf.mxu0 }
 0x115   :  { %372 = vst [vmem:[#allocation2 + $0x18] sm:$0xff] %v282_v32 }
 0x11a   :  { %v330_v33 = vpop.f32.mrf.mxu2 }
 0x11b   :  { %388 = vst [vmem:[#allocation2 + $0x98] sm:$0xff] %v330_v33  ;;  %v354_v34 = vpop.f32.mrf.mxu3 }
 0x11c   :  { %396 = vst [vmem:[#allocation2 + $0xd8] sm:$0xff] %v354_v34  ;;  %v306_v35 = vpop.f32.mrf.mxu1 }
 0x11d   :  { %380 = vst [vmem:[#allocation2 + $0x58] sm:$0xff] %v306_v35 }
 0x122   :  { %v333_v36 = vpop.f32.mrf.mxu2 }
 0x123   :  { %389 = vst [vmem:[#allocation2 + $0xa0] sm:$0xff] %v333_v36  ;;  %v357_v37 = vpop.f32.mrf.mxu3 }
 0x124   :  { %397 = vst [vmem:[#allocation2 + $0xe0] sm:$0xff] %v357_v37  ;;  %v285_v38 = vpop.f32.mrf.mxu0  ;;  %v309_v39 = vpop.f32.mrf.mxu1 }
 0x125   :  { %373 = vst [vmem:[#allocation2 + $0x20] sm:$0xff] %v285_v38 }
 0x126   :  { %381 = vst [vmem:[#allocation2 + $0x60] sm:$0xff] %v309_v39 }
 0x12b   :  { %v336_v40 = vpop.f32.mrf.mxu2 }
 0x12c   :  { %390 = vst [vmem:[#allocation2 + $0xa8] sm:$0xff] %v336_v40  ;;  %v288_v41 = vpop.f32.mrf.mxu0  ;;  %v312_v42 = vpop.f32.mrf.mxu1 }
 0x12d   :  { %374 = vst [vmem:[#allocation2 + $0x28] sm:$0xff] %v288_v41 }
 0x12e   :  { %382 = vst [vmem:[#allocation2 + $0x68] sm:$0xff] %v312_v42 }
 0x133   :  { %v360_v43 = vpop.f32.mrf.mxu3 }
 0x134   :  { %398 = vst [vmem:[#allocation2 + $0xe8] sm:$0xff] %v360_v43  ;;  %v291_v44 = vpop.f32.mrf.mxu0 }
 0x135   :  { %375 = vst [vmem:[#allocation2 + $0x30] sm:$0xff] %v291_v44 }
 0x13a   :  { %v339_v45 = vpop.f32.mrf.mxu2 }
 0x13b   :  { %391 = vst [vmem:[#allocation2 + $0xb0] sm:$0xff] %v339_v45  ;;  %v363_v46 = vpop.f32.mrf.mxu3 }
 0x13c   :  { %399 = vst [vmem:[#allocation2 + $0xf0] sm:$0xff] %v363_v46  ;;  %v315_v47 = vpop.f32.mrf.mxu1 }
 0x13d   :  { %383 = vst [vmem:[#allocation2 + $0x70] sm:$0xff] %v315_v47 }
 0x142   :  { %v342_v48 = vpop.f32.mrf.mxu2 }
 0x143   :  { %392 = vst [vmem:[#allocation2 + $0xb8] sm:$0xff] %v342_v48  ;;  %v366_v49 = vpop.f32.mrf.mxu3 }
 0x144   :  { %400 = vst [vmem:[#allocation2 + $0xf8] sm:$0xff] %v366_v49  ;;  %v294_v50 = vpop.f32.mrf.mxu0  ;;  %v318_v51 = vpop.f32.mrf.mxu1 }
 0x145   :  { %376 = vst [vmem:[#allocation2 + $0x38] sm:$0xff] %v294_v50 }
 0x146   :  { %384 = vst [vmem:[#allocation2 + $0x78] sm:$0xff] %v318_v51 }
 0x147   :  { %413 = dma.vmem_to_hbm [thread:$0]  %s406_s20, 4096, %s408_s23, [#allocation3], %s568_s24, %s568_s24, %s569_s25  }
 0x148   :  { %563 = dma.done.wait [#allocation3], 4096  }
 0x149   :  { %564 = vsyncadd [#allocation3], 4294963200 }
 0x14a   :  { %418 = vsyncpa [#allocation3], 1 }

</bundles_post_ra>
